<compile_context>
chip_gen: v7x
topology: tpu7x:2x2x1
jax: 0.10.0
libtpu: 0.0.40
codegen_flags: <defaults>
</compile_context>

<pallas_src>
import random

import numpy as np
import jax
import jax.numpy as jnp
from jax import lax
from jax.experimental import pallas as pl
from jax.experimental.pallas import tpu as pltpu

ALPHA = 0.2            # LeakyReLU negative slope
L2_EPS = 1e-12         # F.normalize eps
BN_EPS = 1e-5          # BatchNorm1d eps
DENOM_TINY = 1e-20     # guards shared-rowmax exp underflow / empty neighbour rows
VMEM_LIMIT = 40 * 1024 * 1024   # above 16/32 MiB scoped defaults, below v7x physical


# ----------------------------------------------------------------------------
# Host-side glue: NumPy port of the PyTorch sampler_fn (deterministic via seed)
# ----------------------------------------------------------------------------
def sampler_fn(adj):
    adj = np.asarray(adj) > 0
    n = adj.shape[0]
    n_max = int(adj.sum(axis=0).max()) - 1
    nei = []
    for i in range(n):
        tmp = [j for j in range(n) if adj[i, j] and j != i]
        if len(tmp) != n_max:
            tmp = tmp + tmp
            random.shuffle(tmp)
            tmp = tmp[:n_max]
        nei += tmp
    return nei, n_max


def _neighbor_count_matrix(idx, n):
    """C[i, j] = number of node-i neighbour slots that point at node j."""
    m = len(idx) // n
    ids = np.asarray(idx, np.int64).reshape(n, m)
    cnt = np.zeros((n, n), np.float32)
    np.add.at(cnt, (np.repeat(np.arange(n), m), ids.reshape(-1)), 1.0)
    return cnt


def _pick_divisor_tile(total, target):
    """Largest divisor of `total` <= target, preferring 128/16/8 alignment."""
    if total <= target:
        return total
    best16 = best8 = None
    for t in range(target, 0, -1):
        if total % t:
            continue
        if t % 128 == 0:
            return t
        if best16 is None and t % 16 == 0:
            best16 = t
        if best8 is None and t % 8 == 0:
            best8 = t
    if best16 is not None:
        return best16
    if best8 is not None:
        return best8
    # TODO(synk): pad awkward N to a multiple of 128 with zero-count columns/rows
    # (and mask the padded rows out of the BN stats) instead of a full-size block.
    return total


def _pick_batch_block(b, tile_n):
    """Batch elements per grid step: amortise per-step overhead when N is small."""
    cap = max(1, 128 // max(tile_n, 1))
    bt = 1
    for t in range(1, min(b, cap) + 1):
        if b % t == 0:
            bt = t
    return bt


# ----------------------------------------------------------------------------
# Kernel 1: GAT attention (3 adjacencies) + concat + L2-norm + ReLU + BN partials
# ----------------------------------------------------------------------------
def _make_gat_kernel(bt_blk, tile_n, fout):
    c_tot = 4 * fout

    def _gat_kernel(x_ref, c1_ref, c2_ref, c3_ref, wself_ref, wnei_ref,
                    anei_ref, bias_ref, out_ref, stats_ref, xw_s, snei_s):
        i = pl.program_id(1)
        row0 = pl.multiple_of(i * tile_n, tile_n)

        # --- once per batch block: batch-level projections into VMEM scratch ---
        # (the node-tile axis is the innermost, "arbitrary" grid axis, so these
        #  scratch values persist across all node tiles of this batch block)
        @pl.when(i == 0)
        def _():
            for bt in range(bt_blk):
                xb = x_ref[bt]                                        # (N, Fin) bf16
                xw_s[bt] = jnp.dot(
                    xb, wnei_ref[...],
                    preferred_element_type=jnp.float32).astype(jnp.bfloat16)
                snei_s[bt] = lax.dot_general(                          # (1, N) f32
                    anei_ref[...], xb, (((1,), (1,)), ((), ())),
                    preferred_element_type=jnp.float32)

        b_x = bias_ref[0:1, :]                                        # (1, Fout)
        b_nei = bias_ref[1:2, :]                                      # (1, Fout)
        cnt1 = c1_ref[...].astype(jnp.float32)                        # (tile_n, N)
        cnt2 = c2_ref[...].astype(jnp.float32)
        cnt3 = c3_ref[...].astype(jnp.float32)

        sum_acc = jnp.zeros((1, c_tot), jnp.float32)
        sq_acc = jnp.zeros((1, c_tot), jnp.float32)

        # bt_blk is a small compile-time constant -> statically unrolled loop,
        # all ref indexing stays static-sliced.
        for bt in range(bt_blk):
            x_tile = x_ref[bt, pl.ds(row0, tile_n), :]                # (tile_n, Fin)

            # [W_x^T | a_self] applied to this node tile in one MXU call.
            t = jnp.dot(x_tile, wself_ref[...],
                        preferred_element_type=jnp.float32)           # (tile_n, Fout+1)
            h_self = t[:, :fout] + b_x                                 # W_x(x_i)+b_x
            e_self = t[:, fout:fout + 1]                               # a_self.x_i

            # Shared pre-softmax logits and SINGLE exp for all three branches.
            e = e_self + snei_s[bt]                                    # (tile_n, N)
            e = jnp.where(e >= 0, e, ALPHA * e)                        # LeakyReLU(0.2)
            exp_e = jnp.exp(e - jnp.max(e, axis=1, keepdims=True))

            # Per-branch weighted exponentials (softmax over sampled slots,
            # duplicates included) + denominators; normalise AFTER the matmul.
            p1 = cnt1 * exp_e
            p2 = cnt2 * exp_e
            p3 = cnt3 * exp_e
            inv1 = pl.reciprocal(
                jnp.maximum(jnp.sum(p1, axis=1, keepdims=True), DENOM_TINY),
                approx=True)
            inv2 = pl.reciprocal(
                jnp.maximum(jnp.sum(p2, axis=1, keepdims=True), DENOM_TINY),
                approx=True)
            inv3 = pl.reciprocal(
                jnp.maximum(jnp.sum(p3, axis=1, keepdims=True), DENOM_TINY),
                approx=True)

            # One fused MXU call for the three branches (RHS staged once).
            p_all = jnp.concatenate(
                [p1.astype(jnp.bfloat16),
                 p2.astype(jnp.bfloat16),
                 p3.astype(jnp.bfloat16)], axis=0)                     # (3*tile_n, N)
            h_all = jnp.dot(p_all, xw_s[bt],
                            preferred_element_type=jnp.float32)        # (3*tile_n, Fout)
            h1 = h_all[0:tile_n] * inv1 + b_nei
            h2 = h_all[tile_n:2 * tile_n] * inv2 + b_nei
            h3 = h_all[2 * tile_n:3 * tile_n] * inv3 + b_nei

            # Build the concatenated features in registers, L2-normalise (exact
            # F.normalize semantics), ReLU, one lane-dense store.
            hk = jnp.concatenate([h_self, h1, h2, h3], axis=1)         # (tile_n, 4*Fout)
            ssq = jnp.sum(hk * hk, axis=1, keepdims=True)
            inv_n = lax.rsqrt(jnp.maximum(ssq, L2_EPS * L2_EPS))       # 1/max(||hk||,eps)
            out = jnp.maximum(hk * inv_n, 0.0)

            out_ref[bt] = out.astype(out_ref.dtype)                    # bf16 HBM round-trip

            # Fused BatchNorm partial statistics (per grid step, reduced in XLA).
            sum_acc = sum_acc + jnp.sum(out, axis=0, keepdims=True)
            sq_acc = sq_acc + jnp.sum(out * out, axis=0, keepdims=True)

        stats_ref[...] = jnp.concatenate(
            [sum_acc, sq_acc, jnp.zeros((6, c_tot), jnp.float32)], axis=0)

    return _gat_kernel


# ----------------------------------------------------------------------------
# Kernel 2: BatchNorm1d apply — single FMA stream (scale/shift precomputed)
# ----------------------------------------------------------------------------
def _bn_apply_kernel(h_ref, scale_ref, shift_ref, out_ref):
    out_ref[...] = h_ref[...].astype(jnp.float32) * scale_ref[...] + shift_ref[...]


# ----------------------------------------------------------------------------
# Wrapper
# ----------------------------------------------------------------------------
def batched_gat_cat1temporal(x, adj1, adj2, adj3, params):
    B, N, Fin = x.shape
    Fout = params["W_x"].shape[0]
    C = 4 * Fout                      # (num_head * 3 + 1) * outfeat, num_head = 1

    # Host-side neighbour sampling, folded into batch-independent count matrices.
    idx1, _ = sampler_fn(adj1)
    idx2, _ = sampler_fn(adj2)
    idx3, _ = sampler_fn(adj3)
    cnt1 = jnp.asarray(_neighbor_count_matrix(idx1, N), jnp.bfloat16)
    cnt2 = jnp.asarray(_neighbor_count_matrix(idx2, N), jnp.bfloat16)
    cnt3 = jnp.asarray(_neighbor_count_matrix(idx3, N), jnp.bfloat16)

    # bf16 MXU operands; element-wise math stays f32 inside the kernels.
    xb = x.astype(jnp.bfloat16)
    a_self = params["W_a"][:, :Fin].T                                  # (Fin, 1)
    w_self = jnp.concatenate([params["W_x"].T, a_self],
                             axis=1).astype(jnp.bfloat16)              # (Fin, Fout+1)
    w_nei = params["W_neib"].T.astype(jnp.bfloat16)                    # (Fin, Fout)
    a_nei = params["W_a"][:, Fin:].astype(jnp.bfloat16)                # (1, Fin)
    bias2 = jnp.stack([params["b_x"], params["b_neib"]],
                      axis=0).astype(jnp.float32)                      # (2, Fout)

    tile_n = _pick_divisor_tile(N, 128)      # 128 target: v5e MXU / v7x VMEM friendly
    n_tiles = N // tile_n
    bt_blk = _pick_batch_block(B, tile_n)    # small-N: amortise per-step overhead
    n_bblk = B // bt_blk

    gat = pl.pallas_call(
        _make_gat_kernel(bt_blk, tile_n, Fout),
        out_shape=(jax.ShapeDtypeStruct((B, N, C), jnp.bfloat16),
                   jax.ShapeDtypeStruct((n_bblk, n_tiles * 8, C), jnp.float32)),
        grid_spec=pltpu.PrefetchScalarGridSpec(
            num_scalar_prefetch=0,
            grid=(n_bblk, n_tiles),          # batch-block outer, node tiles inner
            in_specs=[
                pl.BlockSpec((bt_blk, N, Fin), lambda b, i: (b, 0, 0)),   # x (resident over i)
                pl.BlockSpec((tile_n, N), lambda b, i: (i, 0)),           # cnt1
                pl.BlockSpec((tile_n, N), lambda b, i: (i, 0)),           # cnt2
                pl.BlockSpec((tile_n, N), lambda b, i: (i, 0)),           # cnt3
                pl.BlockSpec((Fin, Fout + 1), lambda b, i: (0, 0)),       # [W_x^T|a_self]
                pl.BlockSpec((Fin, Fout), lambda b, i: (0, 0)),           # W_neib^T
                pl.BlockSpec((1, Fin), lambda b, i: (0, 0)),              # a_nei
                pl.BlockSpec((2, Fout), lambda b, i: (0, 0)),             # [b_x; b_neib]
            ],
            out_specs=[
                pl.BlockSpec((bt_blk, tile_n, C), lambda b, i: (b, i, 0)),  # h (bf16)
                pl.BlockSpec((None, 8, C), lambda b, i: (b, i, 0)),         # BN partials
            ],
            scratch_shapes=[
                pltpu.VMEM((bt_blk, N, Fout), jnp.bfloat16),   # xw_nei per batch elem
                pltpu.VMEM((bt_blk, 1, N), jnp.float32),       # a_nei . x_j per batch elem
            ],
        ),
        compiler_params=pltpu.CompilerParams(
            dimension_semantics=("parallel", "arbitrary"),
            vmem_limit_bytes=VMEM_LIMIT),
    )
    h, stats = gat(xb, cnt1, cnt2, cnt3, w_self, w_nei, a_nei, bias2)

    # ---- BatchNorm1d (training-mode batch stats over (B, N)) ----
    # Tiny cross-block reduction + scale/shift precompute in XLA (C-sized vectors).
    rows = B * N
    part = stats.reshape(n_bblk * n_tiles, 8, C)
    tot = jnp.sum(part[:, 0, :], axis=0)
    totsq = jnp.sum(part[:, 1, :], axis=0)
    mean = tot / rows
    var = jnp.maximum(totsq / rows - mean * mean, 0.0)     # biased (training) variance
    inv_std = lax.rsqrt(var + BN_EPS)
    scale_f = params["bn_gamma"].astype(jnp.float32) * inv_std
    shift_f = params["bn_beta"].astype(jnp.float32) - mean * scale_f
    scale = scale_f.reshape(1, C)
    shift = shift_f.reshape(1, C)

    h2d = h.reshape(rows, C)                                # bf16 HBM round-trip
    tile_r = _pick_divisor_tile(rows, 1024)

    bn_apply = pl.pallas_call(
        _bn_apply_kernel,
        out_shape=jax.ShapeDtypeStruct((rows, C), jnp.float32),
        grid_spec=pltpu.PrefetchScalarGridSpec(
            num_scalar_prefetch=0,
            grid=(rows // tile_r,),
            in_specs=[
                pl.BlockSpec((tile_r, C), lambda i: (i, 0)),
                pl.BlockSpec((1, C), lambda i: (0, 0)),
                pl.BlockSpec((1, C), lambda i: (0, 0)),
            ],
            out_specs=pl.BlockSpec((tile_r, C), lambda i: (i, 0)),
        ),
        compiler_params=pltpu.CompilerParams(
            dimension_semantics=("parallel",),
            vmem_limit_bytes=VMEM_LIMIT),
    )
    out = bn_apply(h2d, scale, shift)
    # TODO(synk): BatchNorm1d running_mean/running_var buffer updates (training-time
    # side state) are not produced, only the normalised output.
    return out.reshape(B, N, C)


# ----------------------------------------------------------------------------
# Deterministic parameter init (shapes from the module's __init__)
# ----------------------------------------------------------------------------
def init_params(key, fin, fout):
    gain = float(np.sqrt(2.0))  # nn.init.calculate_gain('relu')
    k1, k2, k3, k4, k5 = jax.random.split(key, 5)

    def xavier(k, shape):
        fan_out, fan_in = shape
        a = gain * np.sqrt(6.0 / (fan_in + fan_out))
        return jax.random.uniform(k, shape, jnp.float32, -a, a)

    bb = 1.0 / np.sqrt(fin)
    c = 4 * fout
    return dict(
        W_x=xavier(k1, (fout, fin)),
        b_x=jax.random.uniform(k2, (fout,), jnp.float32, -bb, bb),
        W_neib=xavier(k3, (fout, fin)),
        b_neib=jax.random.uniform(k4, (fout,), jnp.float32, -bb, bb),
        W_a=xavier(k5, (1, 2 * fin)),
        bn_gamma=jnp.ones((c,), jnp.float32),
        bn_beta=jnp.zeros((c,), jnp.float32),
    )


def _circulant_adj(n, deg):
    a = np.zeros((n, n), np.float32)
    for i in range(n):
        for d in range(deg + 1):
            a[i, (i + d) % n] = 1.0
    return a


if __name__ == "__main__":
    random.seed(0)
    B, N, Fin, Fout = 2, 8, 16, 32

    key = jax.random.PRNGKey(0)
    kx, kp = jax.random.split(key)
    x = jax.random.normal(kx, (B, N, Fin), jnp.float32)

    # Circulant adjacencies: every node has exactly `deg` non-self neighbours,
    # so sampler_fn is deterministic (no shuffle branch taken).
    adj1 = _circulant_adj(N, 2)
    adj2 = _circulant_adj(N, 3)
    adj3 = _circulant_adj(N, 4)

    params = init_params(kp, Fin, Fout)

    out = batched_gat_cat1temporal(x, adj1, adj2, adj3, params)
    out = jax.block_until_ready(out)

    assert out.shape == (B, N, 4 * Fout), out.shape
    assert bool(jnp.all(jnp.isfinite(out)))
    print("KERNEL_OK")
</pallas_src>

<mosaic_0001>
module attributes {stable_mosaic.version = 11 : i64} {
  func.func @_gat_kernel(%arg0: i32, %arg1: i32, %arg2: memref<2x8x16xbf16, #tpu.memory_space<vmem>>, %arg3: memref<8x8xbf16, #tpu.memory_space<vmem>>, %arg4: memref<8x8xbf16, #tpu.memory_space<vmem>>, %arg5: memref<8x8xbf16, #tpu.memory_space<vmem>>, %arg6: memref<16x33xbf16, #tpu.memory_space<vmem>>, %arg7: memref<16x32xbf16, #tpu.memory_space<vmem>>, %arg8: memref<1x16xbf16, #tpu.memory_space<vmem>>, %arg9: memref<2x32xf32, #tpu.memory_space<vmem>>, %arg10: memref<2x8x128xbf16, #tpu.memory_space<vmem>>, %arg11: memref<1x8x128xf32, #tpu.memory_space<vmem>>, %arg12: memref<2x8x32xbf16, #tpu.memory_space<vmem>>, %arg13: memref<2x1x8xf32, #tpu.memory_space<vmem>>) attributes {dimension_semantics = [#tpu.dimension_semantics<parallel>, #tpu.dimension_semantics<arbitrary>], iteration_bounds = array<i64: 1, 1>, scalar_prefetch = 0 : i64, scratch_operands = 2 : i64, tpu.core_type = #tpu.core_type<tc>, window_params = [{transform_indices = @transform_0, window_bounds = array<i64: 2, 8, 16>}, {transform_indices = @transform_1, window_bounds = array<i64: 8, 8>}, {transform_indices = @transform_2, window_bounds = array<i64: 8, 8>}, {transform_indices = @transform_3, window_bounds = array<i64: 8, 8>}, {pipeline_mode = #tpu.pipeline_mode<synchronous>, transform_indices = @transform_4, window_bounds = array<i64: 16, 33>}, {pipeline_mode = #tpu.pipeline_mode<synchronous>, transform_indices = @transform_5, window_bounds = array<i64: 16, 32>}, {pipeline_mode = #tpu.pipeline_mode<synchronous>, transform_indices = @transform_6, window_bounds = array<i64: 1, 16>}, {pipeline_mode = #tpu.pipeline_mode<synchronous>, transform_indices = @transform_7, window_bounds = array<i64: 2, 32>}, {transform_indices = @transform_8, window_bounds = array<i64: 2, 8, 128>}, {transform_indices = @transform_9, window_bounds = array<i64: 1, 8, 128>}]} {
    %c8_i32 = arith.constant 8 : i32
    %0 = arith.muli %arg1, %c8_i32 : i32
    %1 = tpu.assume_multiple %0, 8 : i32
    %c0_i32 = arith.constant 0 : i32
    %2 = arith.cmpi eq, %arg1, %c0_i32 : i32
    %3 = arith.extui %2 : i1 to i32
    %c0_i32_0 = arith.constant 0 : i32
    %4 = arith.cmpi ne, %3, %c0_i32_0 : i32
    scf.if %4 {
      %c0_72 = arith.constant 0 : index
      %c0_73 = arith.constant 0 : index
      %c0_74 = arith.constant 0 : index
      %192 = vector.load %arg2[%c0_72, %c0_73, %c0_74] : memref<2x8x16xbf16, #tpu.memory_space<vmem>>, vector<1x8x16xbf16>
      %193 = vector.shape_cast %192 : vector<1x8x16xbf16> to vector<8x16xbf16>
      %c0_75 = arith.constant 0 : index
      %c0_76 = arith.constant 0 : index
      %194 = vector.load %arg7[%c0_75, %c0_76] : memref<16x32xbf16, #tpu.memory_space<vmem>>, vector<16x32xbf16>
      %cst_77 = arith.constant dense<0.000000e+00> : vector<8x32xf32>
      %195 = tpu.matmul %193, %194, %cst_77 {dimension_numbers = #tpu.dot_dimension_numbers<[1], [0], [0], [1], [0, 0, 1, 1], [], []>} : vector<8x16xbf16>, vector<16x32xbf16>, vector<8x32xf32> -> vector<8x32xf32>
      %196 = arith.truncf %195 : vector<8x32xf32> to vector<8x32xbf16>
      %c0_78 = arith.constant 0 : index
      %c0_79 = arith.constant 0 : index
      %c0_80 = arith.constant 0 : index
      %197 = vector.load %arg12[%c0_78, %c0_79, %c0_80] : memref<2x8x32xbf16, #tpu.memory_space<vmem>>, vector<1x8x32xbf16>
      %198 = vector.shape_cast %197 : vector<1x8x32xbf16> to vector<8x32xbf16>
      %199 = vector.shape_cast %196 : vector<8x32xbf16> to vector<1x8x32xbf16>
      tpu.vector_store %arg12[%c0_78, %c0_79, %c0_80], %199 {strides = array<i32>} : memref<2x8x32xbf16, #tpu.memory_space<vmem>>, vector<1x8x32xbf16>,
      %c0_81 = arith.constant 0 : index
      %c0_82 = arith.constant 0 : index
      %200 = vector.load %arg8[%c0_81, %c0_82] : memref<1x16xbf16, #tpu.memory_space<vmem>>, vector<1x16xbf16>
      %cst_83 = arith.constant dense<0.000000e+00> : vector<1x8xf32>
      %201 = tpu.matmul %200, %193, %cst_83 {dimension_numbers = #tpu.dot_dimension_numbers<[1], [1], [0], [0], [0, 0, 1, 0], [], []>} : vector<1x16xbf16>, vector<8x16xbf16>, vector<1x8xf32> -> vector<1x8xf32>
      %c0_84 = arith.constant 0 : index
      %c0_85 = arith.constant 0 : index
      %c0_86 = arith.constant 0 : index
      %202 = vector.load %arg13[%c0_84, %c0_85, %c0_86] : memref<2x1x8xf32, #tpu.memory_space<vmem>>, vector<1x1x8xf32>
      %203 = vector.shape_cast %202 : vector<1x1x8xf32> to vector<1x8xf32>
      %204 = vector.shape_cast %201 : vector<1x8xf32> to vector<1x1x8xf32>
      tpu.vector_store %arg13[%c0_84, %c0_85, %c0_86], %204 {strides = array<i32>} : memref<2x1x8xf32, #tpu.memory_space<vmem>>, vector<1x1x8xf32>,
      %c1_87 = arith.constant 1 : index
      %c0_88 = arith.constant 0 : index
      %c0_89 = arith.constant 0 : index
      %205 = vector.load %arg2[%c1_87, %c0_88, %c0_89] : memref<2x8x16xbf16, #tpu.memory_space<vmem>>, vector<1x8x16xbf16>
      %206 = vector.shape_cast %205 : vector<1x8x16xbf16> to vector<8x16xbf16>
      %c0_90 = arith.constant 0 : index
      %c0_91 = arith.constant 0 : index
      %207 = vector.load %arg7[%c0_90, %c0_91] : memref<16x32xbf16, #tpu.memory_space<vmem>>, vector<16x32xbf16>
      %cst_92 = arith.constant dense<0.000000e+00> : vector<8x32xf32>
      %208 = tpu.matmul %206, %207, %cst_92 {dimension_numbers = #tpu.dot_dimension_numbers<[1], [0], [0], [1], [0, 0, 1, 1], [], []>} : vector<8x16xbf16>, vector<16x32xbf16>, vector<8x32xf32> -> vector<8x32xf32>
      %209 = arith.truncf %208 : vector<8x32xf32> to vector<8x32xbf16>
      %c1_93 = arith.constant 1 : index
      %c0_94 = arith.constant 0 : index
      %c0_95 = arith.constant 0 : index
      %210 = vector.load %arg12[%c1_93, %c0_94, %c0_95] : memref<2x8x32xbf16, #tpu.memory_space<vmem>>, vector<1x8x32xbf16>
      %211 = vector.shape_cast %210 : vector<1x8x32xbf16> to vector<8x32xbf16>
      %212 = vector.shape_cast %209 : vector<8x32xbf16> to vector<1x8x32xbf16>
      tpu.vector_store %arg12[%c1_93, %c0_94, %c0_95], %212 {strides = array<i32>} : memref<2x8x32xbf16, #tpu.memory_space<vmem>>, vector<1x8x32xbf16>,
      %c0_96 = arith.constant 0 : index
      %c0_97 = arith.constant 0 : index
      %213 = vector.load %arg8[%c0_96, %c0_97] : memref<1x16xbf16, #tpu.memory_space<vmem>>, vector<1x16xbf16>
      %cst_98 = arith.constant dense<0.000000e+00> : vector<1x8xf32>
      %214 = tpu.matmul %213, %206, %cst_98 {dimension_numbers = #tpu.dot_dimension_numbers<[1], [1], [0], [0], [0, 0, 1, 0], [], []>} : vector<1x16xbf16>, vector<8x16xbf16>, vector<1x8xf32> -> vector<1x8xf32>
      %c1_99 = arith.constant 1 : index
      %c0_100 = arith.constant 0 : index
      %c0_101 = arith.constant 0 : index
      %215 = vector.load %arg13[%c1_99, %c0_100, %c0_101] : memref<2x1x8xf32, #tpu.memory_space<vmem>>, vector<1x1x8xf32>
      %216 = vector.shape_cast %215 : vector<1x1x8xf32> to vector<1x8xf32>
      %217 = vector.shape_cast %214 : vector<1x8xf32> to vector<1x1x8xf32>
      tpu.vector_store %arg13[%c1_99, %c0_100, %c0_101], %217 {strides = array<i32>} : memref<2x1x8xf32, #tpu.memory_space<vmem>>, vector<1x1x8xf32>,
    } else {
    }
    %c0 = arith.constant 0 : index
    %c0_1 = arith.constant 0 : index
    %5 = vector.load %arg9[%c0, %c0_1] : memref<2x32xf32, #tpu.memory_space<vmem>>, vector<1x32xf32>
    %c1 = arith.constant 1 : index
    %c0_2 = arith.constant 0 : index
    %6 = vector.load %arg9[%c1, %c0_2] : memref<2x32xf32, #tpu.memory_space<vmem>>, vector<1x32xf32>
    %c0_3 = arith.constant 0 : index
    %c0_4 = arith.constant 0 : index
    %7 = vector.load %arg3[%c0_3, %c0_4] : memref<8x8xbf16, #tpu.memory_space<vmem>>, vector<8x8xbf16>
    %8 = arith.extf %7 : vector<8x8xbf16> to vector<8x8xf32>
    %c0_5 = arith.constant 0 : index
    %c0_6 = arith.constant 0 : index
    %9 = vector.load %arg4[%c0_5, %c0_6] : memref<8x8xbf16, #tpu.memory_space<vmem>>, vector<8x8xbf16>
    %10 = arith.extf %9 : vector<8x8xbf16> to vector<8x8xf32>
    %c0_7 = arith.constant 0 : index
    %c0_8 = arith.constant 0 : index
    %11 = vector.load %arg5[%c0_7, %c0_8] : memref<8x8xbf16, #tpu.memory_space<vmem>>, vector<8x8xbf16>
    %12 = arith.extf %11 : vector<8x8xbf16> to vector<8x8xf32>
    %cst = arith.constant 0.000000e+00 : f32
    %13 = vector.broadcast %cst : f32 to vector<1x128xf32>
    %cst_9 = arith.constant 0.000000e+00 : f32
    %14 = vector.broadcast %cst_9 : f32 to vector<1x128xf32>
    %c0_10 = arith.constant 0 : index
    %15 = arith.index_cast %1 : i32 to index
    %c0_11 = arith.constant 0 : index
    %16 = vector.load %arg2[%c0_10, %15, %c0_11] : memref<2x8x16xbf16, #tpu.memory_space<vmem>>, vector<1x8x16xbf16>
    %17 = vector.shape_cast %16 : vector<1x8x16xbf16> to vector<8x16xbf16>
    %c0_12 = arith.constant 0 : index
    %c0_13 = arith.constant 0 : index
    %18 = vector.load %arg6[%c0_12, %c0_13] : memref<16x33xbf16, #tpu.memory_space<vmem>>, vector<16x33xbf16>
    %cst_14 = arith.constant dense<0.000000e+00> : vector<8x33xf32>
    %19 = tpu.matmul %17, %18, %cst_14 {dimension_numbers = #tpu.dot_dimension_numbers<[1], [0], [0], [1], [0, 0, 1, 1], [], []>} : vector<8x16xbf16>, vector<16x33xbf16>, vector<8x33xf32> -> vector<8x33xf32>
    %20 = vector.extract_strided_slice %19 {offsets = [0, 0], sizes = [8, 32], strides = [1, 1]} : vector<8x33xf32> to vector<8x32xf32>
    %21 = vector.broadcast %5 : vector<1x32xf32> to vector<8x32xf32>
    %22 = arith.addf %20, %21 : vector<8x32xf32>
    %23 = vector.extract_strided_slice %19 {offsets = [0, 32], sizes = [8, 1], strides = [1, 1]} : vector<8x33xf32> to vector<8x1xf32>
    %c0_15 = arith.constant 0 : index
    %c0_16 = arith.constant 0 : index
    %c0_17 = arith.constant 0 : index
    %24 = vector.load %arg13[%c0_15, %c0_16, %c0_17] : memref<2x1x8xf32, #tpu.memory_space<vmem>>, vector<1x1x8xf32>
    %25 = vector.shape_cast %24 : vector<1x1x8xf32> to vector<1x8xf32>
    %26 = vector.broadcast %23 : vector<8x1xf32> to vector<8x8xf32>
    %27 = vector.broadcast %25 : vector<1x8xf32> to vector<8x8xf32>
    %28 = arith.addf %26, %27 : vector<8x8xf32>
    %cst_18 = arith.constant 0.000000e+00 : f32
    %29 = vector.broadcast %cst_18 : f32 to vector<8x8xf32>
    %30 = arith.cmpf oge, %28, %29 : vector<8x8xf32>
    %cst_19 = arith.constant 2.000000e-01 : f32
    %31 = vector.broadcast %cst_19 : f32 to vector<8x8xf32>
    %32 = arith.mulf %31, %28 : vector<8x8xf32>
    %33 = arith.select %30, %28, %32 : vector<8x8xi1>, vector<8x8xf32>
    %cst_20 = arith.constant dense<0xFF800000> : vector<8xf32>
    %34 = vector.multi_reduction <maximumf>, %33, %cst_20 [1] : vector<8x8xf32> to vector<8xf32>
    %35 = vector.shape_cast %34 : vector<8xf32> to vector<8x1xf32>
    %36 = vector.broadcast %35 : vector<8x1xf32> to vector<8x8xf32>
    %37 = arith.subf %33, %36 : vector<8x8xf32>
    %38 = math.exp %37 : vector<8x8xf32>
    %39 = arith.mulf %8, %38 : vector<8x8xf32>
    %40 = arith.mulf %10, %38 : vector<8x8xf32>
    %41 = arith.mulf %12, %38 : vector<8x8xf32>
    %cst_21 = arith.constant dense<0.000000e+00> : vector<8xf32>
    %42 = vector.multi_reduction <add>, %39, %cst_21 [1] : vector<8x8xf32> to vector<8xf32>
    %43 = vector.shape_cast %42 : vector<8xf32> to vector<8x1xf32>
    %cst_22 = arith.constant 9.99999968E-21 : f32
    %44 = vector.broadcast %cst_22 : f32 to vector<8x1xf32>
    %45 = arith.maximumf %43, %44 : vector<8x1xf32>
    %46 = tpu.reciprocal %45 {approx = true} : vector<8x1xf32> -> vector<8x1xf32>
    %cst_23 = arith.constant dense<0.000000e+00> : vector<8xf32>
    %47 = vector.multi_reduction <add>, %40, %cst_23 [1] : vector<8x8xf32> to vector<8xf32>
    %48 = vector.shape_cast %47 : vector<8xf32> to vector<8x1xf32>
    %cst_24 = arith.constant 9.99999968E-21 : f32
    %49 = vector.broadcast %cst_24 : f32 to vector<8x1xf32>
    %50 = arith.maximumf %48, %49 : vector<8x1xf32>
    %51 = tpu.reciprocal %50 {approx = true} : vector<8x1xf32> -> vector<8x1xf32>
    %cst_25 = arith.constant dense<0.000000e+00> : vector<8xf32>
    %52 = vector.multi_reduction <add>, %41, %cst_25 [1] : vector<8x8xf32> to vector<8xf32>
    %53 = vector.shape_cast %52 : vector<8xf32> to vector<8x1xf32>
    %cst_26 = arith.constant 9.99999968E-21 : f32
    %54 = vector.broadcast %cst_26 : f32 to vector<8x1xf32>
    %55 = arith.maximumf %53, %54 : vector<8x1xf32>
    %56 = tpu.reciprocal %55 {approx = true} : vector<8x1xf32> -> vector<8x1xf32>
    %57 = arith.truncf %39 : vector<8x8xf32> to vector<8x8xbf16>
    %58 = arith.truncf %40 : vector<8x8xf32> to vector<8x8xbf16>
    %59 = arith.truncf %41 : vector<8x8xf32> to vector<8x8xbf16>
    %60 = tpu.concatenate %57, %58, %59 in 0 : vector<8x8xbf16>, vector<8x8xbf16>, vector<8x8xbf16> -> vector<24x8xbf16>
    %c0_27 = arith.constant 0 : index
    %c0_28 = arith.constant 0 : index
    %c0_29 = arith.constant 0 : index
    %61 = vector.load %arg12[%c0_27, %c0_28, %c0_29] : memref<2x8x32xbf16, #tpu.memory_space<vmem>>, vector<1x8x32xbf16>
    %62 = vector.shape_cast %61 : vector<1x8x32xbf16> to vector<8x32xbf16>
    %cst_30 = arith.constant dense<0.000000e+00> : vector<24x32xf32>
    %63 = tpu.matmul %60, %62, %cst_30 {dimension_numbers = #tpu.dot_dimension_numbers<[1], [0], [0], [1], [0, 0, 1, 1], [], []>} : vector<24x8xbf16>, vector<8x32xbf16>, vector<24x32xf32> -> vector<24x32xf32>
    %64 = vector.extract_strided_slice %63 {offsets = [0, 0], sizes = [8, 32], strides = [1, 1]} : vector<24x32xf32> to vector<8x32xf32>
    %65 = vector.broadcast %46 : vector<8x1xf32> to vector<8x32xf32>
    %66 = arith.mulf %64, %65 : vector<8x32xf32>
    %67 = vector.broadcast %6 : vector<1x32xf32> to vector<8x32xf32>
    %68 = arith.addf %66, %67 : vector<8x32xf32>
    %69 = vector.extract_strided_slice %63 {offsets = [8, 0], sizes = [8, 32], strides = [1, 1]} : vector<24x32xf32> to vector<8x32xf32>
    %70 = vector.broadcast %51 : vector<8x1xf32> to vector<8x32xf32>
    %71 = arith.mulf %69, %70 : vector<8x32xf32>
    %72 = vector.broadcast %6 : vector<1x32xf32> to vector<8x32xf32>
    %73 = arith.addf %71, %72 : vector<8x32xf32>
    %74 = vector.extract_strided_slice %63 {offsets = [16, 0], sizes = [8, 32], strides = [1, 1]} : vector<24x32xf32> to vector<8x32xf32>
    %75 = vector.broadcast %56 : vector<8x1xf32> to vector<8x32xf32>
    %76 = arith.mulf %74, %75 : vector<8x32xf32>
    %77 = vector.broadcast %6 : vector<1x32xf32> to vector<8x32xf32>
    %78 = arith.addf %76, %77 : vector<8x32xf32>
    %79 = tpu.concatenate %22, %68, %73, %78 in 1 : vector<8x32xf32>, vector<8x32xf32>, vector<8x32xf32>, vector<8x32xf32> -> vector<8x128xf32>
    %80 = arith.mulf %79, %79 : vector<8x128xf32>
    %cst_31 = arith.constant dense<0.000000e+00> : vector<8xf32>
    %81 = vector.multi_reduction <add>, %80, %cst_31 [1] : vector<8x128xf32> to vector<8xf32>
    %82 = vector.shape_cast %81 : vector<8xf32> to vector<8x1xf32>
    %cst_32 = arith.constant 1.000000e-24 : f32
    %83 = vector.broadcast %cst_32 : f32 to vector<8x1xf32>
    %84 = arith.maximumf %82, %83 : vector<8x1xf32>
    %85 = math.rsqrt %84 : vector<8x1xf32>
    %86 = vector.broadcast %85 : vector<8x1xf32> to vector<8x128xf32>
    %87 = arith.mulf %79, %86 : vector<8x128xf32>
    %cst_33 = arith.constant 0.000000e+00 : f32
    %88 = vector.broadcast %cst_33 : f32 to vector<8x128xf32>
    %89 = arith.maximumf %87, %88 : vector<8x128xf32>
    %90 = arith.truncf %89 : vector<8x128xf32> to vector<8x128xbf16>
    %c0_34 = arith.constant 0 : index
    %c0_35 = arith.constant 0 : index
    %c0_36 = arith.constant 0 : index
    %91 = vector.load %arg10[%c0_34, %c0_35, %c0_36] : memref<2x8x128xbf16, #tpu.memory_space<vmem>>, vector<1x8x128xbf16>
    %92 = vector.shape_cast %91 : vector<1x8x128xbf16> to vector<8x128xbf16>
    %93 = vector.shape_cast %90 : vector<8x128xbf16> to vector<1x8x128xbf16>
    tpu.vector_store %arg10[%c0_34, %c0_35, %c0_36], %93 {strides = array<i32>} : memref<2x8x128xbf16, #tpu.memory_space<vmem>>, vector<1x8x128xbf16>,
    %cst_37 = arith.constant dense<0.000000e+00> : vector<128xf32>
    %94 = vector.multi_reduction <add>, %89, %cst_37 [0] : vector<8x128xf32> to vector<128xf32>
    %95 = vector.shape_cast %94 : vector<128xf32> to vector<1x128xf32>
    %96 = arith.addf %13, %95 : vector<1x128xf32>
    %97 = arith.mulf %89, %89 : vector<8x128xf32>
    %cst_38 = arith.constant dense<0.000000e+00> : vector<128xf32>
    %98 = vector.multi_reduction <add>, %97, %cst_38 [0] : vector<8x128xf32> to vector<128xf32>
    %99 = vector.shape_cast %98 : vector<128xf32> to vector<1x128xf32>
    %100 = arith.addf %14, %99 : vector<1x128xf32>
    %c1_39 = arith.constant 1 : index
    %101 = arith.index_cast %1 : i32 to index
    %c0_40 = arith.constant 0 : index
    %102 = vector.load %arg2[%c1_39, %101, %c0_40] : memref<2x8x16xbf16, #tpu.memory_space<vmem>>, vector<1x8x16xbf16>
    %103 = vector.shape_cast %102 : vector<1x8x16xbf16> to vector<8x16xbf16>
    %c0_41 = arith.constant 0 : index
    %c0_42 = arith.constant 0 : index
    %104 = vector.load %arg6[%c0_41, %c0_42] : memref<16x33xbf16, #tpu.memory_space<vmem>>, vector<16x33xbf16>
    %cst_43 = arith.constant dense<0.000000e+00> : vector<8x33xf32>
    %105 = tpu.matmul %103, %104, %cst_43 {dimension_numbers = #tpu.dot_dimension_numbers<[1], [0], [0], [1], [0, 0, 1, 1], [], []>} : vector<8x16xbf16>, vector<16x33xbf16>, vector<8x33xf32> -> vector<8x33xf32>
    %106 = vector.extract_strided_slice %105 {offsets = [0, 0], sizes = [8, 32], strides = [1, 1]} : vector<8x33xf32> to vector<8x32xf32>
    %107 = vector.broadcast %5 : vector<1x32xf32> to vector<8x32xf32>
    %108 = arith.addf %106, %107 : vector<8x32xf32>
    %109 = vector.extract_strided_slice %105 {offsets = [0, 32], sizes = [8, 1], strides = [1, 1]} : vector<8x33xf32> to vector<8x1xf32>
    %c1_44 = arith.constant 1 : index
    %c0_45 = arith.constant 0 : index
    %c0_46 = arith.constant 0 : index
    %110 = vector.load %arg13[%c1_44, %c0_45, %c0_46] : memref<2x1x8xf32, #tpu.memory_space<vmem>>, vector<1x1x8xf32>
    %111 = vector.shape_cast %110 : vector<1x1x8xf32> to vector<1x8xf32>
    %112 = vector.broadcast %109 : vector<8x1xf32> to vector<8x8xf32>
    %113 = vector.broadcast %111 : vector<1x8xf32> to vector<8x8xf32>
    %114 = arith.addf %112, %113 : vector<8x8xf32>
    %cst_47 = arith.constant 0.000000e+00 : f32
    %115 = vector.broadcast %cst_47 : f32 to vector<8x8xf32>
    %116 = arith.cmpf oge, %114, %115 : vector<8x8xf32>
    %cst_48 = arith.constant 2.000000e-01 : f32
    %117 = vector.broadcast %cst_48 : f32 to vector<8x8xf32>
    %118 = arith.mulf %117, %114 : vector<8x8xf32>
    %119 = arith.select %116, %114, %118 : vector<8x8xi1>, vector<8x8xf32>
    %cst_49 = arith.constant dense<0xFF800000> : vector<8xf32>
    %120 = vector.multi_reduction <maximumf>, %119, %cst_49 [1] : vector<8x8xf32> to vector<8xf32>
    %121 = vector.shape_cast %120 : vector<8xf32> to vector<8x1xf32>
    %122 = vector.broadcast %121 : vector<8x1xf32> to vector<8x8xf32>
    %123 = arith.subf %119, %122 : vector<8x8xf32>
    %124 = math.exp %123 : vector<8x8xf32>
    %125 = arith.mulf %8, %124 : vector<8x8xf32>
    %126 = arith.mulf %10, %124 : vector<8x8xf32>
    %127 = arith.mulf %12, %124 : vector<8x8xf32>
    %cst_50 = arith.constant dense<0.000000e+00> : vector<8xf32>
    %128 = vector.multi_reduction <add>, %125, %cst_50 [1] : vector<8x8xf32> to vector<8xf32>
    %129 = vector.shape_cast %128 : vector<8xf32> to vector<8x1xf32>
    %cst_51 = arith.constant 9.99999968E-21 : f32
    %130 = vector.broadcast %cst_51 : f32 to vector<8x1xf32>
    %131 = arith.maximumf %129, %130 : vector<8x1xf32>
    %132 = tpu.reciprocal %131 {approx = true} : vector<8x1xf32> -> vector<8x1xf32>
    %cst_52 = arith.constant dense<0.000000e+00> : vector<8xf32>
    %133 = vector.multi_reduction <add>, %126, %cst_52 [1] : vector<8x8xf32> to vector<8xf32>
    %134 = vector.shape_cast %133 : vector<8xf32> to vector<8x1xf32>
    %cst_53 = arith.constant 9.99999968E-21 : f32
    %135 = vector.broadcast %cst_53 : f32 to vector<8x1xf32>
    %136 = arith.maximumf %134, %135 : vector<8x1xf32>
    %137 = tpu.reciprocal %136 {approx = true} : vector<8x1xf32> -> vector<8x1xf32>
    %cst_54 = arith.constant dense<0.000000e+00> : vector<8xf32>
    %138 = vector.multi_reduction <add>, %127, %cst_54 [1] : vector<8x8xf32> to vector<8xf32>
    %139 = vector.shape_cast %138 : vector<8xf32> to vector<8x1xf32>
    %cst_55 = arith.constant 9.99999968E-21 : f32
    %140 = vector.broadcast %cst_55 : f32 to vector<8x1xf32>
    %141 = arith.maximumf %139, %140 : vector<8x1xf32>
    %142 = tpu.reciprocal %141 {approx = true} : vector<8x1xf32> -> vector<8x1xf32>
    %143 = arith.truncf %125 : vector<8x8xf32> to vector<8x8xbf16>
    %144 = arith.truncf %126 : vector<8x8xf32> to vector<8x8xbf16>
    %145 = arith.truncf %127 : vector<8x8xf32> to vector<8x8xbf16>
    %146 = tpu.concatenate %143, %144, %145 in 0 : vector<8x8xbf16>, vector<8x8xbf16>, vector<8x8xbf16> -> vector<24x8xbf16>
    %c1_56 = arith.constant 1 : index
    %c0_57 = arith.constant 0 : index
    %c0_58 = arith.constant 0 : index
    %147 = vector.load %arg12[%c1_56, %c0_57, %c0_58] : memref<2x8x32xbf16, #tpu.memory_space<vmem>>, vector<1x8x32xbf16>
    %148 = vector.shape_cast %147 : vector<1x8x32xbf16> to vector<8x32xbf16>
    %cst_59 = arith.constant dense<0.000000e+00> : vector<24x32xf32>
    %149 = tpu.matmul %146, %148, %cst_59 {dimension_numbers = #tpu.dot_dimension_numbers<[1], [0], [0], [1], [0, 0, 1, 1], [], []>} : vector<24x8xbf16>, vector<8x32xbf16>, vector<24x32xf32> -> vector<24x32xf32>
    %150 = vector.extract_strided_slice %149 {offsets = [0, 0], sizes = [8, 32], strides = [1, 1]} : vector<24x32xf32> to vector<8x32xf32>
    %151 = vector.broadcast %132 : vector<8x1xf32> to vector<8x32xf32>
    %152 = arith.mulf %150, %151 : vector<8x32xf32>
    %153 = vector.broadcast %6 : vector<1x32xf32> to vector<8x32xf32>
    %154 = arith.addf %152, %153 : vector<8x32xf32>
    %155 = vector.extract_strided_slice %149 {offsets = [8, 0], sizes = [8, 32], strides = [1, 1]} : vector<24x32xf32> to vector<8x32xf32>
    %156 = vector.broadcast %137 : vector<8x1xf32> to vector<8x32xf32>
    %157 = arith.mulf %155, %156 : vector<8x32xf32>
    %158 = vector.broadcast %6 : vector<1x32xf32> to vector<8x32xf32>
    %159 = arith.addf %157, %158 : vector<8x32xf32>
    %160 = vector.extract_strided_slice %149 {offsets = [16, 0], sizes = [8, 32], strides = [1, 1]} : vector<24x32xf32> to vector<8x32xf32>
    %161 = vector.broadcast %142 : vector<8x1xf32> to vector<8x32xf32>
    %162 = arith.mulf %160, %161 : vector<8x32xf32>
    %163 = vector.broadcast %6 : vector<1x32xf32> to vector<8x32xf32>
    %164 = arith.addf %162, %163 : vector<8x32xf32>
    %165 = tpu.concatenate %108, %154, %159, %164 in 1 : vector<8x32xf32>, vector<8x32xf32>, vector<8x32xf32>, vector<8x32xf32> -> vector<8x128xf32>
    %166 = arith.mulf %165, %165 : vector<8x128xf32>
    %cst_60 = arith.constant dense<0.000000e+00> : vector<8xf32>
    %167 = vector.multi_reduction <add>, %166, %cst_60 [1] : vector<8x128xf32> to vector<8xf32>
    %168 = vector.shape_cast %167 : vector<8xf32> to vector<8x1xf32>
    %cst_61 = arith.constant 1.000000e-24 : f32
    %169 = vector.broadcast %cst_61 : f32 to vector<8x1xf32>
    %170 = arith.maximumf %168, %169 : vector<8x1xf32>
    %171 = math.rsqrt %170 : vector<8x1xf32>
    %172 = vector.broadcast %171 : vector<8x1xf32> to vector<8x128xf32>
    %173 = arith.mulf %165, %172 : vector<8x128xf32>
    %cst_62 = arith.constant 0.000000e+00 : f32
    %174 = vector.broadcast %cst_62 : f32 to vector<8x128xf32>
    %175 = arith.maximumf %173, %174 : vector<8x128xf32>
    %176 = arith.truncf %175 : vector<8x128xf32> to vector<8x128xbf16>
    %c1_63 = arith.constant 1 : index
    %c0_64 = arith.constant 0 : index
    %c0_65 = arith.constant 0 : index
    %177 = vector.load %arg10[%c1_63, %c0_64, %c0_65] : memref<2x8x128xbf16, #tpu.memory_space<vmem>>, vector<1x8x128xbf16>
    %178 = vector.shape_cast %177 : vector<1x8x128xbf16> to vector<8x128xbf16>
    %179 = vector.shape_cast %176 : vector<8x128xbf16> to vector<1x8x128xbf16>
    tpu.vector_store %arg10[%c1_63, %c0_64, %c0_65], %179 {strides = array<i32>} : memref<2x8x128xbf16, #tpu.memory_space<vmem>>, vector<1x8x128xbf16>,
    %cst_66 = arith.constant dense<0.000000e+00> : vector<128xf32>
    %180 = vector.multi_reduction <add>, %175, %cst_66 [0] : vector<8x128xf32> to vector<128xf32>
    %181 = vector.shape_cast %180 : vector<128xf32> to vector<1x128xf32>
    %182 = arith.addf %96, %181 : vector<1x128xf32>
    %183 = arith.mulf %175, %175 : vector<8x128xf32>
    %cst_67 = arith.constant dense<0.000000e+00> : vector<128xf32>
    %184 = vector.multi_reduction <add>, %183, %cst_67 [0] : vector<8x128xf32> to vector<128xf32>
    %185 = vector.shape_cast %184 : vector<128xf32> to vector<1x128xf32>
    %186 = arith.addf %100, %185 : vector<1x128xf32>
    %cst_68 = arith.constant 0.000000e+00 : f32
    %187 = vector.broadcast %cst_68 : f32 to vector<6x128xf32>
    %188 = tpu.concatenate %182, %186, %187 in 0 : vector<1x128xf32>, vector<1x128xf32>, vector<6x128xf32> -> vector<8x128xf32>
    %c0_69 = arith.constant 0 : index
    %c0_70 = arith.constant 0 : index
    %c0_71 = arith.constant 0 : index
    %189 = vector.load %arg11[%c0_69, %c0_70, %c0_71] : memref<1x8x128xf32, #tpu.memory_space<vmem>>, vector<1x8x128xf32>
    %190 = vector.shape_cast %189 : vector<1x8x128xf32> to vector<8x128xf32>
    %191 = vector.shape_cast %188 : vector<8x128xf32> to vector<1x8x128xf32>
    tpu.vector_store %arg11[%c0_69, %c0_70, %c0_71], %191 {strides = array<i32>} : memref<1x8x128xf32, #tpu.memory_space<vmem>>, vector<1x8x128xf32>,
    return
  }
  func.func @transform_0(%arg0: i32, %arg1: i32) -> (i32, i32, i32) {
    %c0_i32 = arith.constant 0 : i32
    %c0_i32_0 = arith.constant 0 : i32
    %c0_i32_1 = arith.constant 0 : i32
    return %arg0, %c0_i32, %c0_i32_0 : i32, i32, i32
  }
  func.func @transform_1(%arg0: i32, %arg1: i32) -> (i32, i32) {
    %c0_i32 = arith.constant 0 : i32
    %c0_i32_0 = arith.constant 0 : i32
    return %arg1, %c0_i32 : i32, i32
  }
  func.func @transform_2(%arg0: i32, %arg1: i32) -> (i32, i32) {
    %c0_i32 = arith.constant 0 : i32
    %c0_i32_0 = arith.constant 0 : i32
    return %arg1, %c0_i32 : i32, i32
  }
  func.func @transform_3(%arg0: i32, %arg1: i32) -> (i32, i32) {
    %c0_i32 = arith.constant 0 : i32
    %c0_i32_0 = arith.constant 0 : i32
    return %arg1, %c0_i32 : i32, i32
  }
  func.func @transform_4(%arg0: i32, %arg1: i32) -> (i32, i32) {
    %c0_i32 = arith.constant 0 : i32
    %c0_i32_0 = arith.constant 0 : i32
    %c0_i32_1 = arith.constant 0 : i32
    return %c0_i32, %c0_i32_0 : i32, i32
  }
  func.func @transform_5(%arg0: i32, %arg1: i32) -> (i32, i32) {
    %c0_i32 = arith.constant 0 : i32
    %c0_i32_0 = arith.constant 0 : i32
    %c0_i32_1 = arith.constant 0 : i32
    return %c0_i32, %c0_i32_0 : i32, i32
  }
  func.func @transform_6(%arg0: i32, %arg1: i32) -> (i32, i32) {
    %c0_i32 = arith.constant 0 : i32
    %c0_i32_0 = arith.constant 0 : i32
    %c0_i32_1 = arith.constant 0 : i32
    return %c0_i32, %c0_i32_0 : i32, i32
  }
  func.func @transform_7(%arg0: i32, %arg1: i32) -> (i32, i32) {
    %c0_i32 = arith.constant 0 : i32
    %c0_i32_0 = arith.constant 0 : i32
    %c0_i32_1 = arith.constant 0 : i32
    return %c0_i32, %c0_i32_0 : i32, i32
  }
  func.func @transform_8(%arg0: i32, %arg1: i32) -> (i32, i32, i32) {
    %c0_i32 = arith.constant 0 : i32
    %c0_i32_0 = arith.constant 0 : i32
    return %arg0, %arg1, %c0_i32 : i32, i32, i32
  }
  func.func @transform_9(%arg0: i32, %arg1: i32) -> (i32, i32, i32) {
    %c0_i32 = arith.constant 0 : i32
    %c0_i32_0 = arith.constant 0 : i32
    return %arg0, %arg1, %c0_i32 : i32, i32, i32
  }
}

</mosaic_0001>

<bundles_post_ra>
// kernel: tpu_custom_call.1
= control target key start
LH: loop header
LB: loop body
LE: loop exit
PB: predicated region body
PF: predicated region fallthrough
CT: control target
= control target key end

     0   :  { %15 = vsyncpa [#allocation5], 0  ;;  %s1257_s0 = inlined_call_operand.hbm [shape: bf16[2,8,16], index: 0, kind: input, shape index: {}]   ;;  %s1258_s1 = inlined_call_operand.hbm [shape: bf16[8,8], index: 1, kind: input, shape index: {}]   ;;  %s1259_s2 = inlined_call_operand.hbm [shape: bf16[8,8], index: 2, kind: input, shape index: {}]   ;;  %s1260_s3 = inlined_call_operand.hbm [shape: bf16[8,8], index: 3, kind: input, shape index: {}]   ;;  %s1261_s4 = inlined_call_operand.vmem [shape: bf16[16,33], index: 4, kind: input, shape index: {}]   ;;  %s1262_s5 = inlined_call_operand.vmem [shape: bf16[16,32], index: 5, kind: input, shape index: {}]   ;;  %s1263_s6 = inlined_call_operand.vmem [shape: bf16[1,16], index: 6, kind: input, shape index: {}]   ;;  %s1264_s7 = inlined_call_operand.vmem [shape: f32[2,32], index: 7, kind: input, shape index: {}]   ;;  %s1265_s8 = inlined_call_operand.hbm [shape: bf16[2,8,128], index: 8, kind: output, shape index: {0}]   ;;  %s1266_s9 = inlined_call_operand.hbm [shape: f32[1,8,128], index: 9, kind: output, shape index: {1}]  }
   0x1   :  { %16 = vsyncpa [#allocation8], 0 }
   0x2   :  { %17 = vsyncpa [#allocation11], 0 }
   0x3   :  { %18 = vsyncpa [#allocation6], 0 }
   0x4   :  { %19 = vsyncpa [#allocation14], 0  ;;  %s1039_s30 = smov [#allocation7]   ;;  %s1040_s11 = smov [#allocation4]  }
   0x5   :  { %s38_s10 = sshll.u32 %s1039_s30, 4  ;;  %s25_s12 = sshll.u32 %s1040_s11, 4  ;;  %s39_s10 = int_to_ptr.vmem [resolvable:$true] %s38_s10  ;;  %s1102_s12 = int_to_ptr.vmem [resolvable:$true] %s25_s12 }
   0x6   :  { %s897_s15 = scalar_lea.hbm %s1258_s1, 64 }
   0x7   :  { %p898_p0 = scmp.ne.s32.totalorder %s1258_s1, %s897_s15  ;;  %p901_p1 = scmp.lt.u32.totalorder %s897_s15, %s1258_s1 }
   0x9   :  { %p903_p2 = pnand %p901_p1, %p898_p0 }
   0xb   :  { %906 = shalt.err (!%p903_p2)
}
   0xc   :  { %s907_s20 = scalar_lea.vmem %s39_s10, 64  ;;  %p912_p4 = scmp.lt.s32.totalorder %s39_s10, %s39_s10 }
   0xd   :  { %p908_p3 = scmp.ne.s32.totalorder %s39_s10, %s907_s20  ;;  %p913_p5 = scmp.lt.s32.totalorder %s907_s20, %s907_s20 }
   0xf   :  { %p914_p6 = por %p913_p5, %p912_p4 }
  0x11   :  { %p915_p7 = pnand %p914_p6, %p908_p3 }
  0x13   :  { %918 = shalt.err (!%p915_p7)
}
  0x14   :  { %41 = dma.hbm_to_vmem [thread:$0]  %s1258_s1, 64, %s39_s10, [#allocation8]  }
  0x15   :  { %s919_s25 = scalar_lea.hbm %s1257_s0, 128 }
  0x16   :  { %p920_p8 = scmp.ne.s32.totalorder %s1257_s0, %s919_s25  ;;  %p923_p9 = scmp.lt.u32.totalorder %s919_s25, %s1257_s0 }
  0x18   :  { %p925_p10 = pnand %p923_p9, %p920_p8 }
  0x1a   :  { %928 = shalt.err (!%p925_p10)
}
  0x1b   :  { %s929_s30 = scalar_lea.vmem %s1102_s12, 128  ;;  %p934_p12 = scmp.lt.s32.totalorder %s1102_s12, %s1102_s12 }
  0x1c   :  { %p930_p11 = scmp.ne.s32.totalorder %s1102_s12, %s929_s30  ;;  %p935_p13 = scmp.lt.s32.totalorder %s929_s30, %s929_s30 }
  0x1e   :  { %p936_p0 = por %p935_p13, %p934_p12 }
  0x20   :  { %p937_p1 = pnand %p936_p0, %p930_p11 }
  0x22   :  { %940 = shalt.err (!%p937_p1)
}
  0x23   :  { %s1041_s1 = smov 64   ;;  %s1042_s10 = smov 4  }
  0x24   :  { %31 = dma.hbm_to_vmem [thread:$0]  %s1257_s0, 128, %s1102_s12, [#allocation5], %s1041_s1, %s1041_s1, %s1042_s10  }
  0x25   :  { %s1043_s14 = smov [#allocation9]   ;;  %s1044_s16 = smov [#allocation10]  }
  0x26   :  { %s48_s15 = sshll.u32 %s1043_s14, 4  ;;  %s58_s17 = sshll.u32 %s1044_s16, 4  ;;  %s49_s15 = int_to_ptr.vmem [resolvable:$true] %s48_s15  ;;  %s59_s17 = int_to_ptr.vmem [resolvable:$true] %s58_s17 }
  0x27   :  { %s941_s20 = scalar_lea.hbm %s1259_s2, 64 }
  0x28   :  { %p942_p2 = scmp.ne.s32.totalorder %s1259_s2, %s941_s20  ;;  %p945_p3 = scmp.lt.u32.totalorder %s941_s20, %s1259_s2 }
  0x2a   :  { %p947_p4 = pnand %p945_p3, %p942_p2 }
  0x2c   :  { %950 = shalt.err (!%p947_p4)
}
  0x2d   :  { %s951_s0 = scalar_lea.vmem %s49_s15, 64  ;;  %p956_p6 = scmp.lt.s32.totalorder %s49_s15, %s49_s15 }
  0x2e   :  { %p952_p5 = scmp.ne.s32.totalorder %s49_s15, %s951_s0  ;;  %p957_p7 = scmp.lt.s32.totalorder %s951_s0, %s951_s0 }
  0x30   :  { %p958_p8 = por %p957_p7, %p956_p6 }
  0x32   :  { %p959_p9 = pnand %p958_p8, %p952_p5 }
  0x34   :  { %962 = shalt.err (!%p959_p9)
}
  0x35   :  { %51 = dma.hbm_to_vmem [thread:$0]  %s1259_s2, 64, %s49_s15, [#allocation8]  }
  0x36   :  { %s963_s28 = scalar_lea.hbm %s1260_s3, 64 }
  0x37   :  { %p964_p10 = scmp.ne.s32.totalorder %s1260_s3, %s963_s28  ;;  %p967_p11 = scmp.lt.u32.totalorder %s963_s28, %s1260_s3 }
  0x39   :  { %p969_p12 = pnand %p967_p11, %p964_p10 }
  0x3b   :  { %972 = shalt.err (!%p969_p12)
}
  0x3c   :  { %s973_s14 = scalar_lea.vmem %s59_s17, 64  ;;  %p978_p0 = scmp.lt.s32.totalorder %s59_s17, %s59_s17 }
  0x3d   :  { %p974_p13 = scmp.ne.s32.totalorder %s59_s17, %s973_s14  ;;  %p979_p1 = scmp.lt.s32.totalorder %s973_s14, %s973_s14 }
  0x3f   :  { %p980_p2 = por %p979_p1, %p978_p0 }
  0x41   :  { %p981_p3 = pnand %p980_p2, %p974_p13 }
  0x43   :  { %984 = shalt.err (!%p981_p3)
}
  0x44   :  { %61 = dma.hbm_to_vmem [thread:$0]  %s1260_s3, 64, %s59_s17, [#allocation11]  }
  0x45   :  { %1029 = dma.done.wait [#allocation5], 128  }
  0x46   :  { %1030 = vsyncadd [#allocation5], 4294967168 }
  0x47   :  { %1031 = dma.done.wait [#allocation8], 128  }
  0x48   :  { %1032 = vsyncadd [#allocation8], 4294967168 }
  0x49   :  { %1033 = dma.done.wait [#allocation11], 64  }
  0x4a   :  { %1034 = vsyncadd [#allocation11], 4294967232  ;;  %v1045_v0 = vmov 0.0   ;;  %vm1046_vm0 = vmmov 0   ;;  %v873_v1 = vld [vmem:[%s1262_s5] sm:$0xff]   ;;  %vm97_vm1 = vcmask 130048  }
  0x4b   :  { %809 = vmatprep.subr.bf16.mxu0 %v1045_v0  ;;  %811 = vmatprep.mubr.msk.bf16.mxu0 %vm1046_vm0, %v1045_v0  ;;  %v88_v2 = vld [vmem:[#allocation4] sm:$0xf]  ;;  %v874_v3 = vld [vmem:[%s1262_s5] sm:$0xff]   ;;  %v191_v5 = vld [vmem:[#allocation4 + $0x4] sm:$0xf]  ;;  %v1047_v13 = vmov 32  }
  0x4c   :  { %815 = vmatprep.subr.bf16.mxu1 %v1045_v0  ;;  %817 = vmatprep.mubr.msk.bf16.mxu1 %vm1046_vm0, %v1045_v0  ;;  %v99_v4 = vsel %vm97_vm1, %v88_v2, 0  ;;  %v144_v6 = vld [vmem:[%s1263_s6] sm:$0x1]  ;;  %v201_v7 = vsel %vm97_vm1, %v191_v5, 0  ;;  %v304_v10 = vld [vmem:[#allocation4] sm:$0xf] }
  0x4d   :  { %810 = vmatpush3.bf16.msra.mxu0 %v873_v1  ;;  %816 = vmatpush3.bf16.xpose.msra.mxu1 %v99_v4  ;;  %v875_v8 = vld [vmem:[%s1261_s4] sm:$0xff]   ;;  %v524_v12 = vld [vmem:[#allocation4 + $0x4] sm:$0xf]  ;;  %vm142_vm2 = vcmask 257024   ;;  %vm188_vm3 = vcmask 57344   ;;  %vm408_vm4 = vcmask 1043456  }
  0x4e   :  { %821 = vmatprep.subr.bf16.mxu0 %v1045_v0  ;;  %827 = vmatprep.subr.bf16.mxu1 %v1045_v0  ;;  %v246_v9 = vld [vmem:[%s1263_s6] sm:$0x1]  ;;  %vm378_vm6 = vcmask 64512   ;;  %v294_v60 = vld [vmem:[#allocation7] sm:$0xf]  ;;  %s1048_s12 = smov 32  }
  0x4f   :  { %v876_v11 = vld [vmem:[%s1261_s4] sm:$0xff]   ;;  %872 = vset.pattern.permute.xlu0 %v1047_v13  ;;  %v296_v61 = vld [vmem:[#allocation9] sm:$0xf]  ;;  %v298_v63 = vld [vmem:[#allocation10] sm:$0xf]  ;;  %s1049_s25 = smov 96  }
  0x50   :  { %812 = vmatmul.mubr.msk.bf16.vlgmr.msra.gmra.mrb[0].mxu0 %vm97_vm1, %v88_v2  ;;  %v297_v1 = vunpack.c.l.bf16 %v296_v61  ;;  %v299_v2 = vunpack.c.l.bf16 %v298_v63  ;;  %vm491_vm8 = vcmask 261120   ;;  %vm493_vm9 = vcmask 523264  }
  0x51   :  { %822 = vmatpush3.bf16.msra.mxu0 %v874_v3  ;;  %823 = vmatprep.mubr.msk.bf16.mxu0 %vm1046_vm0, %v1045_v0  ;;  %vm495_vm10 = vcmask 785408  }
  0x52   :  { %833 = vmatprep.subr.bf16.mxu0 %v1045_v0 }
  0x54   :  { %818 = vmatmul.mubr.msk.bf16.vlgmr.msra.gmra.mrb[0].mxu1 %vm97_vm1, %v144_v6 }
  0x55   :  { %828 = vmatpush3.bf16.xpose.msra.mxu1 %v201_v7  ;;  %829 = vmatprep.mubr.msk.bf16.mxu1 %vm1046_vm0, %v1045_v0 }
  0x58   :  { %824 = vmatmul.mubr.msk.bf16.vlgmr.msra.gmra.mrb[4].mxu0 %vm97_vm1, %v191_v5 }
  0x59   :  { %834 = vmatpush3.bf16.msra.mxu0 %v875_v8  ;;  %835 = vmatprep.mubr.msk.bf16.mxu0 %vm1046_vm0, %v1045_v0 }
  0x5a   :  { %845 = vmatprep.subr.bf16.mxu0 %v1045_v0 }
  0x5c   :  { %830 = vmatmul.mubr.msk.bf16.vlgmr.msra.gmra.mrb[4].mxu1 %vm97_vm1, %v246_v9 }
  0x60   :  { %836 = vmatmul.mubr.msk.bf16.vlgmr.msra.gmra.mrb[8].mxu0 %vm97_vm1, %v304_v10 }
  0x61   :  { %846 = vmatpush3.bf16.msra.mxu0 %v876_v11  ;;  %847 = vmatprep.mubr.msk.bf16.mxu0 %vm1046_vm0, %v1045_v0  ;;  %v295_v0 = vunpack.c.l.bf16 %v294_v60 }
  0x68   :  { %848 = vmatmul.mubr.msk.bf16.vlgmr.msra.gmra.mrb[12].mxu0 %vm97_vm1, %v524_v12 }
 0x123   :  { %v135_v14 = vpop.f32.mrb[0].mxu0 }
 0x124   :  { %v141_v15 = vpack.c.bf16 %v135_v14, %v135_v14  ;;  %v813_v16 = vpop.f32.mrb[1].mxu0 }
 0x125   :  { %v138_v17 = vpop.f32.mrb[2].mxu0 }
 0x126   :  { %143 = vst.msk [vmem:[#allocation2] sm:$0xf] %vm142_vm2, %v141_v15  ;;  %v814_v18 = vpop.f32.mrb[3].mxu0 }
 0x127   :  { %v182_v19 = vpop.f32.mrb[0].mxu1 }
 0x128   :  { %189 = vst.msk [vmem:[#allocation3] sm:$0x1] %vm188_vm3, %v182_v19  ;;  %v819_v20 = vpop.f32.mrb[1].mxu1 }
 0x129   :  { %v185_v21 = vpop.f32.mrb[2].mxu1 }
 0x12a   :  { %v820_v23 = vpop.f32.mrb[3].mxu1 }
 0x12b   :  { %v237_v22 = vpop.f32.mrb[4].mxu0 }
 0x12c   :  { %v243_v24 = vpack.c.bf16 %v237_v22, %v237_v22  ;;  %v825_v25 = vpop.f32.mrb[5].mxu0 }
 0x12d   :  { %v240_v26 = vpop.f32.mrb[6].mxu0  ;;  %v412_v27 = vld [vmem:[#allocation2] sm:$0xf] }
 0x12e   :  { %245 = vst.msk [vmem:[#allocation2 + $0x4] sm:$0xf] %vm142_vm2, %v243_v24  ;;  %v826_v28 = vpop.f32.mrb[7].mxu0  ;;  %857 = vmatprep.subr.msk.bf16.mxu1 %vm408_vm4, %v412_v27  ;;  %v419_v29 = vsel %vm408_vm4, %v412_v27, 0 }
 0x12f   :  { %840 = vmatpush3.bf16.msra.mxu1 %v419_v29  ;;  %v284_v30 = vpop.f32.mrb[4].mxu1  ;;  %v782_v43 = vld [vmem:[#allocation3] ss:$0 sm:$0xff] }
 0x130   :  { %291 = vst.msk [vmem:[#allocation3 + $0x1] sm:$0x1] %vm188_vm3, %v284_v30  ;;  %v831_v32 = vpop.f32.mrb[5].mxu1 }
 0x131   :  { %v287_v34 = vpop.f32.mrb[6].mxu1 }
 0x132   :  { %v832_v37 = vpop.f32.mrb[7].mxu1 }
 0x133   :  { %v1197_v31 = vpop.f32.mrb[8].mxu0 }
 0x134   :  { %365 = vperm.xlu0 %872, %v1197_v31   ;;  %v837_v33 = vpop.f32.mrb[9].mxu0 }
 0x135   :  { %v354_v35 = vpop.f32.mrb[10].mxu0  ;;  %v627_v36 = vld [vmem:[#allocation2 + $0x4] sm:$0xf] }
 0x136   :  { %v838_v38 = vpop.f32.mrb[11].mxu0  ;;  %858 = vmatprep.subr.msk.bf16.mxu1 %vm408_vm4, %v627_v36  ;;  %v634_v17 = vsel %vm408_vm4, %v627_v36, 0 }
 0x137   :  { %v788_v49 = vld [vmem:[#allocation3 + $0x1] ss:$0 sm:$0xff] }
 0x13b   :  { %v1202_v39 = vpop.f32.mrb[12].mxu0 }
 0x13c   :  { %581 = vperm.xlu0 %872, %v1202_v39   ;;  %v849_v40 = vpop.f32.mrb[13].mxu0 }
 0x13d   :  { %v573_v41 = vpop.f32.mrb[14].mxu0 }
 0x13e   :  { %v850_v42 = vpop.f32.mrb[15].mxu0 }
 0x1b3   :  { %v366_v44 = vpop.permute.xlu0 %365 }
 0x1b4   :  { %v374_v45 = vadd.f32 %v782_v43, %v366_v44  ;;  %v785_v44 = vld [vmem:[%s1264_s7 + $0x1] ss:$0 sm:$0xff] }
 0x1b6   :  { %v376_v46 = vmul.f32 0.2, %v374_v45  ;;  %vm375_vm5 = vcmp.ge.f32.partialorder %v374_v45, 0.0 }
 0x1b8   :  { %v377_v47 = vsel %vm375_vm5, %v374_v45, %v376_v46 }
 0x1b9   :  { %v379_v48 = vsel %vm378_vm6, %v377_v47, -inf }
 0x1ba   :  { %380 = vmax.xlane.f32.xlu1 %v379_v48 }
 0x1bb   :  { %v582_v50 = vpop.permute.xlu0 %581 }
 0x1bc   :  { %v590_v51 = vadd.f32 %v788_v49, %v582_v50 }
 0x1be   :  { %v592_v52 = vmul.f32 0.2, %v590_v51  ;;  %vm591_vm7 = vcmp.ge.f32.partialorder %v590_v51, 0.0 }
 0x1c0   :  { %v593_v53 = vsel %vm591_vm7, %v590_v51, %v592_v52 }
 0x1c1   :  { %v594_v54 = vsel %vm378_vm6, %v593_v53, -inf }
 0x1c2   :  { %595 = vmax.xlane.f32.xlu1 %v594_v54 }
 0x247   :  { %v381_v55 = vpop.xlane.xlu1 %380 }
 0x248   :  { %v382_v56 = vsub.f32 %v377_v47, %v381_v55 }
 0x24a   :  { %v383_v57 = vmul.f32 1.442695, %v382_v56 }
 0x24c   :  { %877 = vpow2.f32 %v383_v57 }
 0x24f   :  { %v596_v58 = vpop.xlane.xlu1 %595 }
 0x250   :  { %v597_v59 = vsub.f32 %v593_v53, %v596_v58 }
 0x252   :  { %v598_v62 = vmul.f32 1.442695, %v597_v59 }
 0x254   :  { %879 = vpow2.f32 %v598_v62 }
 0x256   :  { %v878_v3 = vpop.eup %877 }
 0x257   :  { %v385_v4 = vmul.f32 %v878_v3, %v295_v0  ;;  %v386_v5 = vmul.f32 %v878_v3, %v297_v1  ;;  %v387_v9 = vmul.f32 %v878_v3, %v299_v2 }
 0x259   :  { %v388_v6 = vsel %vm378_vm6, %v385_v4, 0.0  ;;  %v393_v7 = vsel %vm378_vm6, %v386_v5, 0.0  ;;  %v404_v8 = vpack.c.bf16 %v386_v5, %v386_v5  ;;  %v403_v10 = vpack.c.bf16 %v385_v4, %v385_v4 }
 0x25a   :  { %389 = vadd.xlane.f32.xlu0 %v388_v6  ;;  %394 = vadd.xlane.f32.xlu1 %v393_v7  ;;  %v398_v13 = vsel %vm378_vm6, %v387_v9, 0.0  ;;  %v405_v14 = vpack.c.bf16 %v387_v9, %v387_v9  ;;  %v781_v6 = vld [vmem:[%s1264_s7] ss:$0 sm:$0xff]  ;;  %s1050_s7 = smov [#allocation12]  }
 0x25b   :  { %v407_v11 = vrot.slane %v404_v8, 4  ;;  %v361_v8 = vadd.f32 %v781_v6, %v1197_v31  ;;  %s740_s28 = sshll.u32 %s1050_s7, 4  ;;  %s741_s28 = int_to_ptr.vmem [resolvable:$true] %s740_s28 }
 0x25c   :  { %s985_s29 = scalar_lea.vmem %s741_s28, 128  ;;  %p990_p5 = scmp.lt.s32.totalorder %s741_s28, %s741_s28 }
 0x25d   :  { %v411_v12 = vsel %vm408_vm4, %v403_v10, %v407_v11  ;;  %p986_p4 = scmp.ne.s32.totalorder %s741_s28, %s985_s29  ;;  %p991_p6 = scmp.lt.s32.totalorder %s985_s29, %s985_s29 }
 0x25e   :  { %v880_v15 = vpop.eup %879  ;;  %841 = vmatprep.mubr.msk.bf16.mxu1 %vm378_vm6, %v411_v12  ;;  %399 = vadd.xlane.f32.xlu1 %v398_v13 }
 0x25f   :  { %v601_v16 = vmul.f32 %v880_v15, %v297_v1  ;;  %842 = vmatmul.mubr.msk.bf16.vlgmr.msra.gmra.mrb[8].mxu1 %vm378_vm6, %v405_v14  ;;  %v600_v18 = vmul.f32 %v880_v15, %v295_v0  ;;  %v602_v19 = vmul.f32 %v880_v15, %v299_v2  ;;  %p992_p7 = por %p991_p6, %p990_p5 }
 0x260   :  { %852 = vmatpush3.bf16.msra.mxu1 %v634_v17 }
 0x261   :  { %v603_v20 = vsel %vm378_vm6, %v600_v18, 0.0  ;;  %v619_v21 = vpack.c.bf16 %v601_v16, %v601_v16  ;;  %v618_v22 = vpack.c.bf16 %v600_v18, %v600_v18  ;;  %v620_v24 = vpack.c.bf16 %v602_v19, %v602_v19  ;;  %p993_p8 = pnand %p992_p7, %p986_p4 }
 0x262   :  { %604 = vadd.xlane.f32.xlu1 %v603_v20  ;;  %v608_v26 = vsel %vm378_vm6, %v601_v16, 0.0  ;;  %v613_v27 = vsel %vm378_vm6, %v602_v19, 0.0  ;;  %v576_v16 = vadd.f32 %v781_v6, %v1202_v39 }
 0x263   :  { %v622_v23 = vrot.slane %v619_v21, 4 }
 0x265   :  { %v625_v25 = vsel %vm408_vm4, %v618_v22, %v622_v23 }
 0x266   :  { %853 = vmatprep.mubr.msk.bf16.mxu1 %vm378_vm6, %v625_v25  ;;  %609 = vadd.xlane.f32.xlu1 %v608_v26 }
 0x267   :  { %854 = vmatmul.mubr.msk.bf16.vlgmr.msra.gmra.mrb[12].mxu1 %vm378_vm6, %v620_v24 }
 0x26a   :  { %614 = vadd.xlane.f32.xlu1 %v613_v27 }
 0x2e7   :  { %v395_v28 = vpop.xlane.xlu1 %394  ;;  %v390_v30 = vpop.xlane.xlu0 %389 }
 0x2e8   :  { %v391_v33 = vmax.f32 %v390_v30, 1e-20  ;;  %v396_v34 = vmax.f32 %v395_v28, 1e-20 }
 0x2ea   :  { %881 = vrcp.f32 %v391_v33 }
 0x2eb   :  { %v400_v29 = vpop.xlane.xlu1 %399  ;;  %883 = vrcp.f32 %v396_v34 }
 0x2ec   :  { %v401_v36 = vmax.f32 %v400_v29, 1e-20 }
 0x2ee   :  { %885 = vrcp.f32 %v401_v36 }
 0x2ef   :  { %v605_v32 = vpop.xlane.xlu1 %604 }
 0x2f0   :  { %v606_v37 = vmax.f32 %v605_v32, 1e-20 }
 0x2f2   :  { %887 = vrcp.f32 %v606_v37 }
 0x2f3   :  { %v610_v35 = vpop.xlane.xlu1 %609 }
 0x2f4   :  { %v611_v38 = vmax.f32 %v610_v35, 1e-20  ;;  %v882_v42 = vpop.eup %881 }
 0x2f5   :  { %v884_v48 = vpop.eup %883 }
 0x2f6   :  { %889 = vrcp.f32 %v611_v38 }
 0x2f7   :  { %v615_v40 = vpop.xlane.xlu1 %614 }
 0x2f8   :  { %v616_v43 = vmax.f32 %v615_v40, 1e-20  ;;  %v886_v52 = vpop.eup %885 }
 0x2fa   :  { %891 = vrcp.f32 %v616_v43 }
 0x2fc   :  { %v888_v56 = vpop.eup %887 }
 0x300   :  { %v890_v60 = vpop.eup %889 }
 0x304   :  { %v892_v1 = vpop.eup %891 }
 0x332   :  { %v843_v41 = vpop.f32.mrb[8].mxu1 }
 0x333   :  { %v455_v45 = vpop.f32.mrb[9].mxu1  ;;  %v477_v53 = vmul.f32 %v886_v52, %v843_v41 }
 0x334   :  { %v469_v46 = vmul.f32 %v882_v42, %v455_v45  ;;  %v844_v47 = vpop.f32.mrb[10].mxu1 }
 0x335   :  { %v458_v49 = vpop.f32.mrb[11].mxu1  ;;  %v478_v62 = vadd.f32 %v785_v44, %v477_v53 }
 0x336   :  { %v474_v50 = vadd.f32 %v785_v44, %v469_v46  ;;  %v475_v51 = vmul.f32 %v884_v48, %v458_v49 }
 0x338   :  { %480 = vrot.lane.b32.xlu1 %v474_v50, %s1048_s12  ;;  %v476_v55 = vadd.f32 %v785_v44, %v475_v51 }
 0x33a   :  { %v855_v54 = vpop.f32.mrb[12].mxu1 }
 0x33b   :  { %v670_v57 = vpop.f32.mrb[13].mxu1  ;;  %v688_v2 = vmul.f32 %v892_v1, %v855_v54 }
 0x33c   :  { %v684_v58 = vmul.f32 %v888_v56, %v670_v57  ;;  %v856_v59 = vpop.f32.mrb[14].mxu1  ;;  %484 = vrot.lane.b32.xlu1 %v476_v55, %s1041_s1 }
 0x33d   :  { %v673_v61 = vpop.f32.mrb[15].mxu1  ;;  %v689_v4 = vadd.f32 %v785_v44, %v688_v2 }
 0x33e   :  { %v685_v63 = vadd.f32 %v785_v44, %v684_v58  ;;  %v686_v0 = vmul.f32 %v890_v60, %v673_v61 }
 0x340   :  { %691 = vrot.lane.b32.xlu0 %v685_v63, %s1048_s12  ;;  %488 = vrot.lane.b32.xlu1 %v478_v62, %s1049_s25  ;;  %v687_v3 = vadd.f32 %v785_v44, %v686_v0 }
 0x344   :  { %695 = vrot.lane.b32.xlu1 %v687_v3, %s1041_s1 }
 0x348   :  { %699 = vrot.lane.b32.xlu1 %v689_v4, %s1049_s25 }
 0x3aa   :  { %v481_v5 = vpop.permute.xlu1 %480 }
 0x3ab   :  { %v492_v9 = vsel %vm491_vm8, %v361_v8, %v481_v5 }
 0x3ae   :  { %v485_v7 = vpop.permute.xlu1 %484 }
 0x3af   :  { %v494_v10 = vsel %vm493_vm9, %v492_v9, %v485_v7 }
 0x3b2   :  { %v489_v11 = vpop.permute.xlu1 %488  ;;  %v692_v14 = vpop.permute.xlu0 %691 }
 0x3b3   :  { %v496_v12 = vsel %vm495_vm10, %v494_v10, %v489_v11  ;;  %v702_v17 = vsel %vm491_vm8, %v576_v16, %v692_v14 }
 0x3b4   :  { %v497_v13 = vmul.f32 %v496_v12, %v496_v12 }
 0x3b6   :  { %498 = vadd.xlane.f32.xlu0 %v497_v13  ;;  %v696_v15 = vpop.permute.xlu1 %695 }
 0x3b7   :  { %v703_v18 = vsel %vm493_vm9, %v702_v17, %v696_v15 }
 0x3ba   :  { %v700_v19 = vpop.permute.xlu1 %699 }
 0x3bb   :  { %v704_v20 = vsel %vm495_vm10, %v703_v18, %v700_v19 }
 0x3bc   :  { %v705_v21 = vmul.f32 %v704_v20, %v704_v20 }
 0x3be   :  { %706 = vadd.xlane.f32.xlu1 %v705_v21 }
 0x443   :  { %v499_v22 = vpop.xlane.xlu0 %498 }
 0x444   :  { %v500_v31 = vmax.f32 %v499_v22, 1e-24 }
 0x446   :  { %893 = vrsqrt.f32 %v500_v31 }
 0x44b   :  { %v707_v23 = vpop.xlane.xlu1 %706 }
 0x44c   :  { %v708_v24 = vmax.f32 %v707_v23, 1e-24 }
 0x44e   :  { %895 = vrsqrt.f32 %v708_v24 }
 0x450   :  { %v894_v25 = vpop.eup %893 }
 0x451   :  { %v502_v26 = vmul.f32 %v894_v25, %v496_v12 }
 0x453   :  { %v503_v27 = vmax.f32 %v502_v26, 0.0 }
 0x455   :  { %v504_v28 = vpack.c.bf16 %v503_v27, %v503_v27  ;;  %v513_v29 = vmul.f32 %v503_v27, %v503_v27  ;;  %v506_v30 = vrot.slane %v503_v27, 4 }
 0x457   :  { %505 = vst [vmem:[#allocation12] sm:$0xf] %v504_v28  ;;  %v514_v39 = vrot.slane %v513_v29, 4  ;;  %v507_v34 = vadd.f32 %v506_v30, %v503_v27 }
 0x458   :  { %v896_v32 = vpop.eup %895 }
 0x459   :  { %v710_v33 = vmul.f32 %v896_v32, %v704_v20  ;;  %v515_v35 = vadd.f32 %v514_v39, %v513_v29  ;;  %v508_v40 = vrot.slane %v507_v34, 2 }
 0x45b   :  { %v711_v36 = vmax.f32 %v710_v33, 0.0  ;;  %v516_v41 = vrot.slane %v515_v35, 2 }
 0x45d   :  { %v712_v37 = vpack.c.bf16 %v711_v36, %v711_v36  ;;  %v715_v38 = vrot.slane %v711_v36, 4  ;;  %v722_v42 = vmul.f32 %v711_v36, %v711_v36 }
 0x45f   :  { %714 = vst [vmem:[#allocation12 + $0x4] sm:$0xf] %v712_v37  ;;  %v716_v43 = vadd.f32 %v715_v38, %v711_v36 }
 0x460   :  { %996 = shalt.err (!%p993_p8)
}
 0x461   :  { %s997_s13 = scalar_lea.hbm %s1265_s8, 128 }
 0x462   :  { %p998_p9 = scmp.ne.s32.totalorder %s1265_s8, %s997_s13  ;;  %p1001_p10 = scmp.lt.u32.totalorder %s997_s13, %s1265_s8 }
 0x464   :  { %p1003_p11 = pnand %p1001_p10, %p998_p9 }
 0x466   :  { %1006 = shalt.err (!%p1003_p11)
}
 0x467   :  { %746 = dma.vmem_to_hbm [thread:$0]  %s741_s28, 128, %s1265_s8, [#allocation6], %s1041_s1, %s1041_s1, %s1042_s10   ;;  %v723_v44 = vrot.slane %v722_v42, 4  ;;  %v717_v45 = vrot.slane %v716_v43, 2  ;;  %v509_v46 = vadd.f32 %v508_v40, %v507_v34  ;;  %v517_v47 = vadd.f32 %v516_v41, %v515_v35 }
 0x468   :  { %vm730_vm11 = vcmask 1040384   ;;  %s1051_s17 = smov [#allocation13]   ;;  %vm732_vm12 = vcmask 1041408  }
 0x469   :  { %v724_v48 = vadd.f32 %v723_v44, %v722_v42  ;;  %v718_v49 = vadd.f32 %v717_v45, %v716_v43  ;;  %v510_v52 = vrot.slane %v509_v46, 1  ;;  %v518_v53 = vrot.slane %v517_v47, 1  ;;  %s753_s19 = sshll.u32 %s1051_s17, 4  ;;  %s754_s19 = int_to_ptr.vmem [resolvable:$true] %s753_s19 }
 0x46a   :  { %s1007_s8 = scalar_lea.vmem %s754_s19, 128  ;;  %p1012_p13 = scmp.lt.s32.totalorder %s754_s19, %s754_s19 }
 0x46b   :  { %v725_v50 = vrot.slane %v724_v48, 2  ;;  %v719_v51 = vrot.slane %v718_v49, 1  ;;  %v511_v57 = vadd.f32 %v510_v52, %v509_v46  ;;  %v519_v58 = vadd.f32 %v518_v53, %v517_v47  ;;  %p1008_p12 = scmp.ne.s32.totalorder %s754_s19, %s1007_s8  ;;  %p1013_p0 = scmp.lt.s32.totalorder %s1007_s8, %s1007_s8 }
 0x46d   :  { %v726_v54 = vadd.f32 %v725_v50, %v724_v48  ;;  %v720_v55 = vadd.f32 %v719_v51, %v718_v49  ;;  %p1014_p1 = por %p1013_p0, %p1012_p13 }
 0x46f   :  { %v727_v56 = vrot.slane %v726_v54, 1  ;;  %v721_v60 = vadd.f32 %v720_v55, %v511_v57  ;;  %p1015_p2 = pnand %p1014_p1, %p1008_p12 }
 0x471   :  { %v728_v59 = vadd.f32 %v727_v56, %v726_v54 }
 0x473   :  { %v729_v61 = vadd.f32 %v728_v59, %v519_v58 }
 0x475   :  { %v731_v62 = vsel %vm730_vm11, %v721_v60, %v729_v61 }
 0x476   :  { %v733_v63 = vsel %vm732_vm12, %v731_v62, 0.0 }
 0x477   :  { %734 = vst [vmem:[#allocation13] sm:$0xff] %v733_v63 }
 0x478   :  { %1018 = shalt.err (!%p1015_p2)
}
 0x479   :  { %s1019_s20 = scalar_lea.hbm %s1266_s9, 128 }
 0x47a   :  { %p1020_p3 = scmp.ne.s32.totalorder %s1266_s9, %s1019_s20  ;;  %p1023_p4 = scmp.lt.u32.totalorder %s1019_s20, %s1266_s9 }
 0x47c   :  { %p1025_p5 = pnand %p1023_p4, %p1020_p3 }
 0x47e   :  { %1028 = shalt.err (!%p1025_p5)
}
 0x47f   :  { %756 = dma.vmem_to_hbm [thread:$0]  %s754_s19, 128, %s1266_s9, [#allocation14]  }
 0x480   :  { %1035 = dma.done.wait [#allocation6], 128  }
 0x481   :  { %1036 = vsyncadd [#allocation6], 4294967168 }
 0x482   :  { %1037 = dma.done.wait [#allocation14], 128  }
 0x483   :  { %1038 = vsyncadd [#allocation14], 4294967168 }
 0x484   :  { %763 = vsyncpa [#allocation5], 1 }
 0x485   :  { %764 = vsyncpa [#allocation8], 1 }
 0x486   :  { %765 = vsyncpa [#allocation11], 1 }
 0x487   :  { %766 = vsyncpa [#allocation6], 1 }
 0x488   :  { %767 = vsyncpa [#allocation14], 1 }

</bundles_post_ra>
